<compile_context>
chip_gen: v7x
topology: tpu7x:2x2x1
jax: 0.10.0
libtpu: 0.0.40
codegen_flags: <defaults>
</compile_context>

<pallas_src>
import functools
import math

import jax
import jax.numpy as jnp
from jax import lax
from jax.experimental import pallas as pl
from jax.experimental.pallas import tpu as pltpu


_LANES = 512     # lane-dense last dim (multiple of 128)
_TR_MAX = 1024   # max row tile -> 1024*512*4B = 2 MiB per f32 input block
_CHUNK = 128     # in-kernel sublane chunk (rows) -> 256 KiB f32 temporaries


def _round_up(a, b):
    return -(-a // b) * b


def _int_pow(base, p):
    """base ** p for non-negative integer p via multiply chain (no EUP pow)."""
    result = None
    cur = base
    while p:
        if p & 1:
            result = cur if result is None else result * cur
        cur = cur * cur
        p >>= 1
    return jnp.ones_like(base) if result is None else result


def _focal_elementwise(x, t, alpha, gamma, logits, binary_targets=False):
    """Per-element focal loss in f32, matching torch semantics."""
    if logits:
        # binary_cross_entropy_with_logits (stable form)
        bce = jnp.maximum(x, 0.0) - x * t + jnp.log1p(jnp.exp(-jnp.abs(x)))
        pt = jnp.exp(-bce)
    elif binary_targets:
        # Exact for t in {0, 1}: 1 transcendental/element instead of 3.
        pt = jnp.where(t > 0.5, x, 1.0 - x)
        bce = jnp.minimum(-jnp.log(pt), 100.0)   # torch clamps log at -100
    else:
        # binary_cross_entropy clamps log terms at -100 (PyTorch behavior)
        log_p = jnp.maximum(jnp.log(x), -100.0)
        log_1mp = jnp.maximum(jnp.log(1.0 - x), -100.0)
        bce = -(t * log_p + (1.0 - t) * log_1mp)
        pt = jnp.exp(-bce)
    q = 1.0 - pt
    g = float(gamma)
    if g == 0.0:
        mod = jnp.ones_like(q)
    elif g.is_integer() and 0 < g <= 64:
        mod = _int_pow(q, int(g))          # multiply chain, no EUP pow
    else:
        # q can be exactly 0 (perfectly classified / garbage rows); clamp so the
        # exp(gamma*log(q)) lowering of ** never forms 0*(-inf).
        mod = jnp.maximum(q, jnp.finfo(jnp.float32).tiny) ** g
    return alpha * mod * bce


def _focal_partial_kernel(x_ref, t_ref, o_ref, *, alpha, gamma, logits,
                          binary_targets, chunk, rows, need_mask):
    """Fused elementwise + partial sum.  Streams the (tr, LANES) block in
    `chunk`-row pieces, accumulating into a register-resident (8, LANES) f32
    carry, then folds to a lane-dense (8, 128) partial for writeback."""
    tr, lanes = x_ref.shape
    base = pl.program_id(0) * tr
    acc = jnp.zeros((8, lanes), jnp.float32)
    for c in range(tr // chunk):                 # static, fully unrolled
        off = c * chunk
        x = x_ref[pl.ds(off, chunk), :].astype(jnp.float32)
        t = t_ref[pl.ds(off, chunk), :].astype(jnp.float32)
        f = _focal_elementwise(x, t, alpha, gamma, logits, binary_targets)
        if need_mask:
            # Last grid block may extend past `rows`; zero the garbage rows
            # (select never propagates NaN from the unselected operand).
            row = base + off + lax.broadcasted_iota(jnp.int32, (chunk, lanes), 0)
            f = jnp.where(row < rows, f, 0.0)
        # (chunk, lanes) -> (chunk//8, 8, lanes) is layout-preserving; sum over
        # the leading axis is pure VPU vreg adds.
        acc = acc + f.reshape(chunk // 8, 8, lanes).sum(axis=0)
    # Fold (8, LANES) -> (8, 128): 128-aligned lane slices are whole vregs.
    folded = acc[:, 0:128]
    for j in range(1, lanes // 128):
        folded = folded + acc[:, j * 128:(j + 1) * 128]
    o_ref[...] = folded


def _focal_map_kernel(x_ref, t_ref, o_ref, *, alpha, gamma, logits,
                      binary_targets, chunk):
    """Elementwise focal loss, chunked so temporaries stay chunk-sized.
    Out-of-bounds rows of the ragged last block are dropped by Pallas."""
    tr, _ = x_ref.shape
    for c in range(tr // chunk):                 # static, fully unrolled
        sl = pl.ds(c * chunk, chunk)
        x = x_ref[sl, :].astype(jnp.float32)
        t = t_ref[sl, :].astype(jnp.float32)
        f = _focal_elementwise(x, t, alpha, gamma, logits, binary_targets)
        o_ref[sl, :] = f.astype(o_ref.dtype)


def binary_focal_loss(inputs, targets, *, alpha=0.5, gamma=4, logits=False,
                      reduce=True, binary_targets=False):
    """Pallas implementation of BinaryFocalLoss.forward.

    binary_targets=True enables a cheaper pt computation (exact when targets
    are 0/1); default False keeps the exact torch formula for soft targets.
    """
    orig_shape = inputs.shape
    n_total = int(math.prod(orig_shape))
    out_dtype = (inputs.dtype if jnp.issubdtype(inputs.dtype, jnp.floating)
                 else jnp.float32)

    x_flat = inputs.reshape(-1)            # free for contiguous arrays
    t_flat = targets.reshape(-1)
    rows = n_total // _LANES
    tail = n_total - rows * _LANES

    # Sub-512-element tail (or an entirely tiny input): plain jnp, no kernel.
    if tail:
        x_tail = x_flat[rows * _LANES:].astype(jnp.float32)
        t_tail = t_flat[rows * _LANES:].astype(jnp.float32)
        f_tail = _focal_elementwise(x_tail, t_tail, float(alpha), float(gamma),
                                    bool(logits), bool(binary_targets))
    if rows == 0:
        if reduce:
            return (jnp.sum(f_tail) / n_total).astype(out_dtype)
        return f_tail.astype(out_dtype).reshape(orig_shape)

    x_main = x_flat[:rows * _LANES] if tail else x_flat
    t_main = t_flat[:rows * _LANES] if tail else t_flat
    x2 = x_main.reshape(rows, _LANES)
    t2 = t_main.reshape(rows, _LANES)

    # Row tile: packed-dtype sublane multiple, >=2 blocks when possible (so the
    # "parallel" grid axis feeds both v7x TensorCores), capped for VMEM.
    sub = max(8,
              32 // jnp.dtype(inputs.dtype).itemsize,
              32 // jnp.dtype(targets.dtype).itemsize)
    tr = max(sub, min(_TR_MAX, _round_up(-(-rows // 2), sub)))
    chunk = min(_CHUNK, tr)
    tr = _round_up(tr, chunk)
    num_blocks = -(-rows // tr)
    need_mask = (rows % tr) != 0

    compiler_params = pltpu.CompilerParams(
        dimension_semantics=("parallel",),
        vmem_limit_bytes=32 * 1024 * 1024,   # safe on v5e/v6e/v7x
    )
    common = dict(alpha=float(alpha), gamma=float(gamma), logits=bool(logits),
                  binary_targets=bool(binary_targets), chunk=chunk)

    if reduce:
        kernel = functools.partial(_focal_partial_kernel, rows=rows,
                                   need_mask=need_mask, **common)
        partials = pl.pallas_call(
            kernel,
            out_shape=jax.ShapeDtypeStruct((num_blocks * 8, 128), jnp.float32),
            grid_spec=pltpu.PrefetchScalarGridSpec(
                num_scalar_prefetch=0,
                grid=(num_blocks,),
                in_specs=[pl.BlockSpec((tr, _LANES), lambda i: (i, 0)),
                          pl.BlockSpec((tr, _LANES), lambda i: (i, 0))],
                out_specs=pl.BlockSpec((8, 128), lambda i: (i, 0))),
            compiler_params=compiler_params,
        )(x2, t2)
        total = jnp.sum(partials)             # tiny tree reduce outside kernel
        if tail:
            total = total + jnp.sum(f_tail)
        return (total / n_total).astype(out_dtype)
    else:
        kernel = functools.partial(_focal_map_kernel, **common)
        out = pl.pallas_call(
            kernel,
            out_shape=jax.ShapeDtypeStruct((rows, _LANES), out_dtype),
            grid_spec=pltpu.PrefetchScalarGridSpec(
                num_scalar_prefetch=0,
                grid=(num_blocks,),
                in_specs=[pl.BlockSpec((tr, _LANES), lambda i: (i, 0)),
                          pl.BlockSpec((tr, _LANES), lambda i: (i, 0))],
                out_specs=pl.BlockSpec((tr, _LANES), lambda i: (i, 0))),
            compiler_params=compiler_params,
        )(x2, t2)
        if tail:
            out_flat = jnp.concatenate([out.reshape(-1),
                                        f_tail.astype(out_dtype)])
            return out_flat.reshape(orig_shape)
        return out.reshape(orig_shape)        # free reshape, no slice-copy


if __name__ == "__main__":
    key = jax.random.PRNGKey(0)
    k1, k2, k3, k4 = jax.random.split(key, 4)

    # ---- Test 1: BinaryFocalLoss() defaults (alpha=0.5, gamma=4, logits=False)
    shape = (2, 4, 16, 16)  # NCHW
    inputs = jax.nn.sigmoid(jax.random.normal(k1, shape, dtype=jnp.float32))
    targets = (jax.random.uniform(k2, shape) > 0.5).astype(jnp.float32)

    loss = jax.block_until_ready(binary_focal_loss(inputs, targets))
    fmap = jax.block_until_ready(binary_focal_loss(inputs, targets, reduce=False))
    loss_fast = jax.block_until_ready(
        binary_focal_loss(inputs, targets, binary_targets=True))

    ref_map = _focal_elementwise(inputs, targets, 0.5, 4.0, False)
    ref = jnp.mean(ref_map)
    assert jnp.allclose(loss, ref, rtol=1e-5, atol=1e-6), (loss, ref)
    assert fmap.shape == shape
    assert jnp.allclose(fmap, ref_map, rtol=1e-5, atol=1e-6)
    assert jnp.allclose(loss_fast, ref, rtol=1e-4, atol=1e-6), (loss_fast, ref)

    # ---- Test 2: ragged size (945 elems, lane tail), logits=True, gamma=1.5
    shape2 = (3, 5, 7, 9)
    logits2 = jax.random.normal(k3, shape2, dtype=jnp.float32)
    targets2 = (jax.random.uniform(k4, shape2) > 0.5).astype(jnp.float32)

    loss2 = jax.block_until_ready(
        binary_focal_loss(logits2, targets2, alpha=0.25, gamma=1.5,
                          logits=True, reduce=True))
    fmap2 = jax.block_until_ready(
        binary_focal_loss(logits2, targets2, alpha=0.25, gamma=1.5,
                          logits=True, reduce=False))
    ref_map2 = _focal_elementwise(logits2, targets2, 0.25, 1.5, True)
    ref2 = jnp.mean(ref_map2)
    assert jnp.allclose(loss2, ref2, rtol=1e-5, atol=1e-6), (loss2, ref2)
    assert fmap2.shape == shape2
    assert jnp.allclose(fmap2, ref_map2, rtol=1e-5, atol=1e-6)

    print("KERNEL_OK")
</pallas_src>

<mosaic_0001>
module attributes {stable_mosaic.version = 11 : i64} {
  func.func @_focal_partial_kernel(%arg0: i32, %arg1: memref<8x512xf32, #tpu.memory_space<vmem>>, %arg2: memref<8x512xf32, #tpu.memory_space<vmem>>, %arg3: memref<8x128xf32, #tpu.memory_space<vmem>>) attributes {dimension_semantics = [#tpu.dimension_semantics<parallel>], iteration_bounds = array<i64: 1>, scalar_prefetch = 0 : i64, scratch_operands = 0 : i64, tpu.core_type = #tpu.core_type<tc>, window_params = [{transform_indices = @transform_0, window_bounds = array<i64: 8, 512>}, {transform_indices = @transform_1, window_bounds = array<i64: 8, 512>}, {transform_indices = @transform_2, window_bounds = array<i64: 8, 128>}]} {
    %c8_i32 = arith.constant 8 : i32
    %0 = arith.muli %arg0, %c8_i32 : i32
    %cst = arith.constant 0.000000e+00 : f32
    %1 = vector.broadcast %cst : f32 to vector<8x512xf32>
    %c0 = arith.constant 0 : index
    %c0_0 = arith.constant 0 : index
    %2 = vector.load %arg1[%c0, %c0_0] : memref<8x512xf32, #tpu.memory_space<vmem>>, vector<8x512xf32>
    %c0_1 = arith.constant 0 : index
    %c0_2 = arith.constant 0 : index
    %3 = vector.load %arg2[%c0_1, %c0_2] : memref<8x512xf32, #tpu.memory_space<vmem>>, vector<8x512xf32>
    %4 = math.log %2 : vector<8x512xf32>
    %cst_3 = arith.constant -1.000000e+02 : f32
    %5 = vector.broadcast %cst_3 : f32 to vector<8x512xf32>
    %6 = arith.maximumf %4, %5 : vector<8x512xf32>
    %cst_4 = arith.constant 1.000000e+00 : f32
    %7 = vector.broadcast %cst_4 : f32 to vector<8x512xf32>
    %8 = arith.subf %7, %2 : vector<8x512xf32>
    %9 = math.log %8 : vector<8x512xf32>
    %cst_5 = arith.constant -1.000000e+02 : f32
    %10 = vector.broadcast %cst_5 : f32 to vector<8x512xf32>
    %11 = arith.maximumf %9, %10 : vector<8x512xf32>
    %12 = arith.mulf %3, %6 : vector<8x512xf32>
    %cst_6 = arith.constant 1.000000e+00 : f32
    %13 = vector.broadcast %cst_6 : f32 to vector<8x512xf32>
    %14 = arith.subf %13, %3 : vector<8x512xf32>
    %15 = arith.mulf %14, %11 : vector<8x512xf32>
    %16 = arith.addf %12, %15 : vector<8x512xf32>
    %cst_7 = arith.constant 0.000000e+00 : f32
    %17 = vector.broadcast %cst_7 : f32 to vector<8x512xf32>
    %18 = arith.subf %17, %16 : vector<8x512xf32>
    %cst_8 = arith.constant 0.000000e+00 : f32
    %19 = vector.broadcast %cst_8 : f32 to vector<8x512xf32>
    %20 = arith.subf %19, %18 : vector<8x512xf32>
    %21 = math.exp %20 : vector<8x512xf32>
    %cst_9 = arith.constant 1.000000e+00 : f32
    %22 = vector.broadcast %cst_9 : f32 to vector<8x512xf32>
    %23 = arith.subf %22, %21 : vector<8x512xf32>
    %24 = arith.mulf %23, %23 : vector<8x512xf32>
    %25 = arith.mulf %24, %24 : vector<8x512xf32>
    %cst_10 = arith.constant 5.000000e-01 : f32
    %26 = vector.broadcast %cst_10 : f32 to vector<8x512xf32>
    %27 = arith.mulf %26, %25 : vector<8x512xf32>
    %28 = arith.mulf %27, %18 : vector<8x512xf32>
    %c0_i32 = arith.constant 0 : i32
    %29 = arith.addi %0, %c0_i32 : i32
    %30 = tpu.iota {dimensions = array<i32: 0>} : vector<8x512xi32>
    %31 = vector.broadcast %29 : i32 to vector<8x512xi32>
    %32 = arith.addi %31, %30 : vector<8x512xi32>
    %c4_i32 = arith.constant 4 : i32
    %33 = vector.broadcast %c4_i32 : i32 to vector<8x512xi32>
    %34 = arith.cmpi slt, %32, %33 : vector<8x512xi32>
    %cst_11 = arith.constant 0.000000e+00 : f32
    %35 = vector.broadcast %cst_11 : f32 to vector<8x512xf32>
    %36 = arith.select %34, %28, %35 : vector<8x512xi1>, vector<8x512xf32>
    %37 = vector.shape_cast %36 : vector<8x512xf32> to vector<1x8x512xf32>
    %cst_12 = arith.constant dense<0.000000e+00> : vector<8x512xf32>
    %38 = vector.multi_reduction <add>, %37, %cst_12 [0] : vector<1x8x512xf32> to vector<8x512xf32>
    %39 = arith.addf %1, %38 : vector<8x512xf32>
    %40 = vector.extract_strided_slice %39 {offsets = [0, 0], sizes = [8, 128], strides = [1, 1]} : vector<8x512xf32> to vector<8x128xf32>
    %41 = vector.extract_strided_slice %39 {offsets = [0, 128], sizes = [8, 128], strides = [1, 1]} : vector<8x512xf32> to vector<8x128xf32>
    %42 = arith.addf %40, %41 : vector<8x128xf32>
    %43 = vector.extract_strided_slice %39 {offsets = [0, 256], sizes = [8, 128], strides = [1, 1]} : vector<8x512xf32> to vector<8x128xf32>
    %44 = arith.addf %42, %43 : vector<8x128xf32>
    %45 = vector.extract_strided_slice %39 {offsets = [0, 384], sizes = [8, 128], strides = [1, 1]} : vector<8x512xf32> to vector<8x128xf32>
    %46 = arith.addf %44, %45 : vector<8x128xf32>
    %c0_13 = arith.constant 0 : index
    %c0_14 = arith.constant 0 : index
    %47 = vector.load %arg3[%c0_13, %c0_14] : memref<8x128xf32, #tpu.memory_space<vmem>>, vector<8x128xf32>
    tpu.vector_store %arg3[%c0_13, %c0_14], %46 {strides = array<i32>} : memref<8x128xf32, #tpu.memory_space<vmem>>, vector<8x128xf32>,
    return
  }
  func.func @transform_0(%arg0: i32) -> (i32, i32) {
    %c0_i32 = arith.constant 0 : i32
    %c0_i32_0 = arith.constant 0 : i32
    return %arg0, %c0_i32 : i32, i32
  }
  func.func @transform_1(%arg0: i32) -> (i32, i32) {
    %c0_i32 = arith.constant 0 : i32
    %c0_i32_0 = arith.constant 0 : i32
    return %arg0, %c0_i32 : i32, i32
  }
  func.func @transform_2(%arg0: i32) -> (i32, i32) {
    %c0_i32 = arith.constant 0 : i32
    %c0_i32_0 = arith.constant 0 : i32
    return %arg0, %c0_i32 : i32, i32
  }
}

</mosaic_0001>

<bundles_post_ra>
// kernel: tpu_custom_call.1
= control target key start
LH: loop header
LB: loop body
LE: loop exit
PB: predicated region body
PF: predicated region fallthrough
CT: control target
= control target key end

     0   :  { %7 = vsyncpa [#allocation3], 0  ;;  %s335_s0 = inlined_call_operand.hbm [shape: f32[4,512], index: 0, kind: input, shape index: {}]   ;;  %s336_s1 = inlined_call_operand.hbm [shape: f32[4,512], index: 1, kind: input, shape index: {}]   ;;  %s337_s2 = inlined_call_operand.hbm [shape: f32[8,128], index: 2, kind: output, shape index: {}]  }
   0x1   :  { %8 = vsyncpa [#allocation6], 0 }
   0x2   :  { %9 = vsyncpa [#allocation4], 0 }
   0x3   :  { %14 = vsyncadd [#allocation3], 256  ;;  %s279_s9 = smov [#allocation2]   ;;  %s207_s13 = scalar_lea.hbm %s335_s0, 256 }
   0x4   :  { %s15_s10 = sshll.u32 %s279_s9, 4  ;;  %p208_p0 = scmp.ne.s32.totalorder %s335_s0, %s207_s13  ;;  %s16_s10 = int_to_ptr.vmem [resolvable:$true] %s15_s10 }
   0x5   :  { %p211_p1 = scmp.lt.u32.totalorder %s207_s13, %s335_s0 }
   0x7   :  { %p213_p2 = pnand %p211_p1, %p208_p0 }
   0x9   :  { %216 = shalt.err (!%p213_p2)
}
   0xa   :  { %s217_s18 = scalar_lea.vmem %s16_s10, 256  ;;  %s221_s19 = scalar_lea.vmem %s16_s10, 512 }
   0xb   :  { %p218_p3 = scmp.ne.s32.totalorder %s16_s10, %s217_s18  ;;  %p222_p4 = scmp.lt.s32.totalorder %s16_s10, %s16_s10 }
   0xc   :  { %p223_p5 = scmp.lt.s32.totalorder %s221_s19, %s217_s18 }
   0xe   :  { %p224_p6 = por %p223_p5, %p222_p4 }
  0x10   :  { %p225_p7 = pnand %p224_p6, %p218_p3 }
  0x12   :  { %228 = shalt.err (!%p225_p7)
}
  0x13   :  { %s280_s20 = smov 256   ;;  %s281_s21 = smov 16  }
  0x14   :  { %21 = dma.hbm_to_vmem [thread:$0]  %s335_s0, 256, %s16_s10, [#allocation3], %s280_s20, %s280_s20, %s281_s21  }
  0x15   :  { %26 = vsyncadd [#allocation6], 256  ;;  %s282_s24 = smov [#allocation5]   ;;  %s229_s28 = scalar_lea.hbm %s336_s1, 256 }
  0x16   :  { %s27_s25 = sshll.u32 %s282_s24, 4  ;;  %p230_p8 = scmp.ne.s32.totalorder %s336_s1, %s229_s28  ;;  %s28_s25 = int_to_ptr.vmem [resolvable:$true] %s27_s25 }
  0x17   :  { %p233_p9 = scmp.lt.u32.totalorder %s229_s28, %s336_s1 }
  0x19   :  { %p235_p10 = pnand %p233_p9, %p230_p8 }
  0x1b   :  { %238 = shalt.err (!%p235_p10)
}
  0x1c   :  { %s239_s5 = scalar_lea.vmem %s28_s25, 256  ;;  %s243_s0 = scalar_lea.vmem %s28_s25, 512 }
  0x1d   :  { %p240_p11 = scmp.ne.s32.totalorder %s28_s25, %s239_s5  ;;  %p244_p12 = scmp.lt.s32.totalorder %s28_s25, %s28_s25 }
  0x1e   :  { %p245_p13 = scmp.lt.s32.totalorder %s243_s0, %s239_s5 }
  0x20   :  { %p246_p0 = por %p245_p13, %p244_p12 }
  0x22   :  { %p247_p1 = pnand %p246_p0, %p240_p11 }
  0x24   :  { %250 = shalt.err (!%p247_p1)
}
  0x25   :  { %33 = dma.hbm_to_vmem [thread:$0]  %s336_s1, 256, %s28_s25, [#allocation6], %s280_s20, %s280_s20, %s281_s21  }
  0x26   :  { %273 = dma.done.wait [#allocation3], 512  }
  0x27   :  { %274 = vsyncadd [#allocation3], 4294966784 }
  0x28   :  { %275 = dma.done.wait [#allocation6], 512  }
  0x29   :  { %276 = vsyncadd [#allocation6], 4294966784  ;;  %v41_v0 = vld [vmem:[#allocation2] sm:$0xff]  ;;  %v42_v1 = vld [vmem:[#allocation2 + $0x8] sm:$0xff]  ;;  %s283_s1 = smov [#allocation7]  }
  0x2a   :  { %v43_v2 = vld [vmem:[#allocation2 + $0x10] sm:$0xff]  ;;  %v44_v3 = vld [vmem:[#allocation2 + $0x18] sm:$0xff]  ;;  %183 = vlog2.f32 %v41_v0  ;;  %v61_v4 = vsub.f32 1.0, %v41_v0  ;;  %v62_v5 = vsub.f32 1.0, %v42_v1  ;;  %v45_v12 = vld [vmem:[#allocation5] sm:$0xff]  ;;  %s168_s8 = sshll.u32 %s283_s1, 4  ;;  %s169_s8 = int_to_ptr.vmem [resolvable:$true] %s168_s8 }
  0x2b   :  { %185 = vlog2.f32 %v42_v1  ;;  %v63_v6 = vsub.f32 1.0, %v43_v2  ;;  %v64_v7 = vsub.f32 1.0, %v44_v3  ;;  %v46_v15 = vld [vmem:[#allocation5 + $0x8] sm:$0xff]  ;;  %v47_v19 = vld [vmem:[#allocation5 + $0x10] sm:$0xff]  ;;  %v48_v23 = vld [vmem:[#allocation5 + $0x18] sm:$0xff]  ;;  %v81_v26 = vsub.f32 1.0, %v45_v12  ;;  %p256_p3 = scmp.lt.s32.totalorder %s169_s8, %s169_s8 }
  0x2c   :  { %187 = vlog2.f32 %v43_v2  ;;  %v82_v30 = vsub.f32 1.0, %v46_v15  ;;  %v83_v35 = vsub.f32 1.0, %v47_v19  ;;  %v84_v39 = vsub.f32 1.0, %v48_v23  ;;  %s251_s9 = scalar_lea.vmem %s169_s8, 128 }
  0x2d   :  { %189 = vlog2.f32 %v44_v3  ;;  %p252_p2 = scmp.ne.s32.totalorder %s169_s8, %s251_s9  ;;  %p257_p4 = scmp.lt.s32.totalorder %s251_s9, %s251_s9 }
  0x2e   :  { %191 = vlog2.f32 %v61_v4 }
  0x2f   :  { %193 = vlog2.f32 %v62_v5  ;;  %p258_p5 = por %p257_p4, %p256_p3 }
  0x30   :  { %195 = vlog2.f32 %v63_v6 }
  0x31   :  { %197 = vlog2.f32 %v64_v7  ;;  %p259_p6 = pnand %p258_p5, %p252_p2 }
  0x34   :  { %v184_v8 = vpop.eup %183 }
  0x35   :  { %v186_v9 = vpop.eup %185  ;;  %v50_v10 = vmul.f32 0.6931472, %v184_v8 }
  0x36   :  { %v188_v11 = vpop.eup %187  ;;  %v52_v13 = vmul.f32 0.6931472, %v186_v9 }
  0x37   :  { %v190_v14 = vpop.eup %189  ;;  %v54_v16 = vmul.f32 0.6931472, %v188_v11  ;;  %v57_v17 = vmax.f32 %v50_v10, -100.0  ;;  %v129_v10 = vlaneseq }
  0x38   :  { %v192_v18 = vpop.eup %191  ;;  %v56_v20 = vmul.f32 0.6931472, %v190_v14  ;;  %v58_v21 = vmax.f32 %v52_v13, -100.0 }
  0x39   :  { %v194_v22 = vpop.eup %193  ;;  %v59_v24 = vmax.f32 %v54_v16, -100.0  ;;  %v66_v25 = vmul.f32 0.6931472, %v192_v18  ;;  %v77_v34 = vmul.f32 %v57_v17, %v45_v12 }
  0x3a   :  { %v196_v27 = vpop.eup %195  ;;  %v60_v28 = vmax.f32 %v56_v20, -100.0  ;;  %v68_v29 = vmul.f32 0.6931472, %v194_v22  ;;  %v78_v38 = vmul.f32 %v58_v21, %v46_v15 }
  0x3b   :  { %v198_v31 = vpop.eup %197  ;;  %v70_v32 = vmul.f32 0.6931472, %v196_v27  ;;  %v73_v33 = vmax.f32 %v66_v25, -100.0  ;;  %v79_v41 = vmul.f32 %v59_v24, %v47_v19  ;;  %v130_v19 = vshrl.u32 %v129_v10, 7 }
  0x3c   :  { %v72_v36 = vmul.f32 0.6931472, %v198_v31  ;;  %v74_v37 = vmax.f32 %v68_v29, -100.0  ;;  %v80_v44 = vmul.f32 %v60_v28, %v48_v23 }
  0x3d   :  { %v75_v40 = vmax.f32 %v70_v32, -100.0  ;;  %v85_v42 = vmul.f32 %v81_v26, %v73_v33  ;;  %vm133_vm0 = vcmp.lt.s32.totalorder %v130_v19, 4 }
  0x3e   :  { %v76_v43 = vmax.f32 %v72_v36, -100.0  ;;  %v86_v45 = vmul.f32 %v82_v30, %v74_v37 }
  0x3f   :  { %v87_v46 = vmul.f32 %v83_v35, %v75_v40  ;;  %v89_v47 = vadd.f32 %v85_v42, %v77_v34 }
  0x40   :  { %v88_v48 = vmul.f32 %v84_v39, %v76_v43  ;;  %v90_v49 = vadd.f32 %v86_v45, %v78_v38 }
  0x41   :  { %v91_v50 = vadd.f32 %v87_v46, %v79_v41  ;;  %v93_v51 = vsub.f32 0.0, %v89_v47 }
  0x42   :  { %v92_v52 = vadd.f32 %v88_v48, %v80_v44  ;;  %v94_v53 = vsub.f32 0.0, %v90_v49 }
  0x43   :  { %v95_v54 = vsub.f32 0.0, %v91_v50  ;;  %v97_v55 = vsub.f32 0.0, %v93_v51 }
  0x44   :  { %v96_v56 = vsub.f32 0.0, %v92_v52  ;;  %v98_v57 = vsub.f32 0.0, %v94_v53 }
  0x45   :  { %v99_v58 = vsub.f32 0.0, %v95_v54  ;;  %v101_v59 = vmul.f32 1.442695, %v97_v55 }
  0x46   :  { %v100_v60 = vsub.f32 0.0, %v96_v56  ;;  %v103_v61 = vmul.f32 1.442695, %v98_v57 }
  0x47   :  { %199 = vpow2.f32 %v101_v59  ;;  %v105_v62 = vmul.f32 1.442695, %v99_v58 }
  0x48   :  { %201 = vpow2.f32 %v103_v61  ;;  %v107_v63 = vmul.f32 1.442695, %v100_v60 }
  0x49   :  { %203 = vpow2.f32 %v105_v62 }
  0x4a   :  { %205 = vpow2.f32 %v107_v63 }
  0x51   :  { %v200_v0 = vpop.eup %199 }
  0x52   :  { %v202_v1 = vpop.eup %201  ;;  %v109_v2 = vsub.f32 1.0, %v200_v0 }
  0x53   :  { %v204_v3 = vpop.eup %203  ;;  %v110_v4 = vsub.f32 1.0, %v202_v1 }
  0x54   :  { %v206_v5 = vpop.eup %205  ;;  %v111_v6 = vsub.f32 1.0, %v204_v3  ;;  %v113_v7 = vmul.f32 %v109_v2, %v109_v2 }
  0x55   :  { %v112_v8 = vsub.f32 1.0, %v206_v5  ;;  %v114_v9 = vmul.f32 %v110_v4, %v110_v4 }
  0x56   :  { %v115_v11 = vmul.f32 %v111_v6, %v111_v6  ;;  %v117_v12 = vmul.f32 %v113_v7, %v113_v7 }
  0x57   :  { %v116_v13 = vmul.f32 %v112_v8, %v112_v8  ;;  %v118_v14 = vmul.f32 %v114_v9, %v114_v9 }
  0x58   :  { %v119_v15 = vmul.f32 %v115_v11, %v115_v11  ;;  %v121_v16 = vmul.f32 0.5, %v117_v12 }
  0x59   :  { %v120_v17 = vmul.f32 %v116_v13, %v116_v13  ;;  %v122_v18 = vmul.f32 0.5, %v118_v14 }
  0x5a   :  { %v123_v20 = vmul.f32 0.5, %v119_v15  ;;  %v125_v21 = vmul.f32 %v121_v16, %v93_v51 }
  0x5b   :  { %v124_v22 = vmul.f32 0.5, %v120_v17  ;;  %v126_v23 = vmul.f32 %v122_v18, %v94_v53 }
  0x5c   :  { %v127_v24 = vmul.f32 %v123_v20, %v95_v54 }
  0x5d   :  { %v128_v25 = vmul.f32 %v124_v22, %v96_v56 }
  0x5e   :  { %v138_v26 = vcombine.low %v125_v21, %v127_v24  ;;  %v139_v27 = vcombine.high %v125_v21, %v127_v24 }
  0x5f   :  { %v140_v28 = vcombine.low %v126_v23, %v128_v25  ;;  %v141_v29 = vcombine.high %v126_v23, %v128_v25 }
  0x60   :  { %v146_v30 = vsel %vm133_vm0, %v138_v26, 0.0  ;;  %v147_v31 = vsel %vm133_vm0, %v139_v27, 0.0 }
  0x61   :  { %v148_v32 = vsel %vm133_vm0, %v140_v28, 0.0  ;;  %v158_v33 = vadd.f32 %v147_v31, %v146_v30  ;;  %v149_v34 = vsel %vm133_vm0, %v141_v29, 0.0 }
  0x63   :  { %v159_v35 = vadd.f32 %v158_v33, %v148_v32 }
  0x65   :  { %v160_v36 = vadd.f32 %v159_v35, %v149_v34 }
  0x67   :  { %161 = vst [vmem:[#allocation7] sm:$0xff] %v160_v36 }
  0x68   :  { %262 = shalt.err (!%p259_p6)
}
  0x69   :  { %s263_s12 = scalar_lea.hbm %s337_s2, 128 }
  0x6a   :  { %p264_p7 = scmp.ne.s32.totalorder %s337_s2, %s263_s12  ;;  %p267_p8 = scmp.lt.u32.totalorder %s263_s12, %s337_s2 }
  0x6c   :  { %p269_p9 = pnand %p267_p8, %p264_p7 }
  0x6e   :  { %272 = shalt.err (!%p269_p9)
}
  0x6f   :  { %171 = dma.vmem_to_hbm [thread:$0]  %s169_s8, 128, %s337_s2, [#allocation4]  }
  0x70   :  { %277 = dma.done.wait [#allocation4], 128  }
  0x71   :  { %278 = vsyncadd [#allocation4], 4294967168 }
  0x72   :  { %175 = vsyncpa [#allocation3], 1 }
  0x73   :  { %176 = vsyncpa [#allocation6], 1 }
  0x74   :  { %177 = vsyncpa [#allocation4], 1 }

</bundles_post_ra>
